<compile_context>
chip_gen: v7x
topology: tpu7x:2x2x1
jax: 0.10.0
libtpu: 0.0.40
codegen_flags: <defaults>
</compile_context>

<pallas_src>
import jax
import jax.numpy as jnp
from jax.experimental import pallas as pl
from jax.experimental.pallas import tpu as pltpu


def _round_up(n, m):
    return ((n + m - 1) // m) * m


def _mlp_kernel(x_ref, w1_ref, b1_ref, w2_ref, b2_ref, w3_ref, b3_ref, o_ref):
    # (TB, 16) -> (16, TB): put the batch dimension on the 128-lane axis so all
    # downstream activations and the output store are lane-dense.
    xt = x_ref[...].T                                                   # (16, TB)
    # Linear(16, 8) + ReLU:  (8,16) @ (16,TB) + (8,1)
    h1 = jnp.dot(w1_ref[...], xt, preferred_element_type=jnp.float32)
    h1 = jnp.maximum(h1 + b1_ref[...], 0.0)                             # (8, TB)
    # Linear(8, 4) + ReLU:   (4,8) @ (8,TB) + (4,1)
    h2 = jnp.dot(w2_ref[...], h1, preferred_element_type=jnp.float32)
    h2 = jnp.maximum(h2 + b2_ref[...], 0.0)                             # (4, TB)
    # Linear(4, 1):          (1,4) @ (4,TB) + (1,1)   -> dense (1, TB) store
    o_ref[...] = jnp.dot(w3_ref[...], h2, preferred_element_type=jnp.float32) + b3_ref[...]


def sequential_dnn_forward(x, params, *, block_rows=8192):
    """Runs the 16->8->ReLU->8->4->ReLU->4->1 MLP. x: (B, 16) f32 -> (B, 1) f32."""
    w1, b1, w2, b2, w3, b3 = params
    B, F = x.shape
    assert F == 16, "SequentialDNN expects 16 input features"

    # Batch tile: multiple of 128 (lane-dense output block), capped at block_rows.
    tb = min(block_rows, _round_up(B, 128))
    padded_b = _round_up(B, tb)
    if padded_b != B:
        x = jnp.pad(x, ((0, padded_b - B), (0, 0)))
    grid = (padded_b // tb,)

    def const_spec(a):
        # Full-array block, constant index -> DMA'd once, VMEM-resident for all steps.
        return pl.BlockSpec(a.shape, lambda i: (0, 0))

    out = pl.pallas_call(
        _mlp_kernel,
        out_shape=jax.ShapeDtypeStruct((1, padded_b), jnp.float32),
        grid=grid,
        in_specs=[
            pl.BlockSpec((tb, 16), lambda i: (i, 0)),   # streamed x tiles
            const_spec(w1), const_spec(b1),
            const_spec(w2), const_spec(b2),
            const_spec(w3), const_spec(b3),
        ],
        out_specs=pl.BlockSpec((1, tb), lambda i: (0, i)),
        compiler_params=pltpu.CompilerParams(
            dimension_semantics=("parallel",),          # shard batch tiles across TCs (v7x)
            vmem_limit_bytes=32 * 1024 * 1024,          # headroom on v5e; safe on v6e/v7x
        ),
    )(x, w1, b1, w2, b2, w3, b3)

    return out[0, :B].reshape(B, 1)


def init_params(key):
    """Deterministic init matching nn.Linear: weight (out, in), bias stored (out, 1),
    uniform(-1/sqrt(in), 1/sqrt(in)) like PyTorch defaults."""
    dims = [(16, 8), (8, 4), (4, 1)]
    params = []
    for i, (d_in, d_out) in enumerate(dims):
        kw, kb = jax.random.split(jax.random.fold_in(key, i))
        bound = 1.0 / jnp.sqrt(d_in)
        w = jax.random.uniform(kw, (d_out, d_in), jnp.float32, -bound, bound)
        b = jax.random.uniform(kb, (d_out, 1), jnp.float32, -bound, bound)
        params += [w, b]
    return tuple(params)


def _reference_forward(x, params):
    w1, b1, w2, b2, w3, b3 = params
    h1 = jnp.maximum(x @ w1.T + b1.T, 0.0)
    h2 = jnp.maximum(h1 @ w2.T + b2.T, 0.0)
    return h2 @ w3.T + b3.T


if __name__ == "__main__":
    key = jax.random.PRNGKey(0)
    params = init_params(key)
    x = jax.random.normal(jax.random.fold_in(key, 100), (8, 16), jnp.float32)

    out = jax.block_until_ready(sequential_dnn_forward(x, params))

    ref = _reference_forward(x, params)
    assert out.shape == (8, 1)
    assert jnp.allclose(out, ref, atol=1e-5, rtol=1e-5)
    print("KERNEL_OK")
</pallas_src>

<mosaic_0001>
module attributes {stable_mosaic.version = 11 : i64} {
  func.func @_mlp_kernel(%arg0: i32, %arg1: memref<128x16xf32, #tpu.memory_space<vmem>>, %arg2: memref<8x16xf32, #tpu.memory_space<vmem>>, %arg3: memref<8x1xf32, #tpu.memory_space<vmem>>, %arg4: memref<4x8xf32, #tpu.memory_space<vmem>>, %arg5: memref<4x1xf32, #tpu.memory_space<vmem>>, %arg6: memref<1x4xf32, #tpu.memory_space<vmem>>, %arg7: memref<1x1xf32, #tpu.memory_space<vmem>>, %arg8: memref<1x128xf32, #tpu.memory_space<vmem>>) attributes {dimension_semantics = [#tpu.dimension_semantics<parallel>], iteration_bounds = array<i64: 1>, scalar_prefetch = 0 : i64, scratch_operands = 0 : i64, tpu.core_type = #tpu.core_type<tc>, window_params = [{transform_indices = @transform_0, window_bounds = array<i64: 128, 16>}, {pipeline_mode = #tpu.pipeline_mode<synchronous>, transform_indices = @transform_1, window_bounds = array<i64: 8, 16>}, {pipeline_mode = #tpu.pipeline_mode<synchronous>, transform_indices = @transform_2, window_bounds = array<i64: 8, 1>}, {pipeline_mode = #tpu.pipeline_mode<synchronous>, transform_indices = @transform_3, window_bounds = array<i64: 4, 8>}, {pipeline_mode = #tpu.pipeline_mode<synchronous>, transform_indices = @transform_4, window_bounds = array<i64: 4, 1>}, {pipeline_mode = #tpu.pipeline_mode<synchronous>, transform_indices = @transform_5, window_bounds = array<i64: 1, 4>}, {pipeline_mode = #tpu.pipeline_mode<synchronous>, transform_indices = @transform_6, window_bounds = array<i64: 1, 1>}, {transform_indices = @transform_7, window_bounds = array<i64: 1, 128>}]} {
    %c0 = arith.constant 0 : index
    %c0_0 = arith.constant 0 : index
    %0 = vector.load %arg1[%c0, %c0_0] : memref<128x16xf32, #tpu.memory_space<vmem>>, vector<128x16xf32>
    %1 = tpu.transpose %0, [1, 0] : vector<128x16xf32> -> vector<16x128xf32>
    %c0_1 = arith.constant 0 : index
    %c0_2 = arith.constant 0 : index
    %2 = vector.load %arg2[%c0_1, %c0_2] : memref<8x16xf32, #tpu.memory_space<vmem>>, vector<8x16xf32>
    %cst = arith.constant dense<0.000000e+00> : vector<8x128xf32>
    %3 = tpu.matmul %2, %1, %cst {dimension_numbers = #tpu.dot_dimension_numbers<[1], [0], [0], [1], [0, 0, 1, 1], [], []>} : vector<8x16xf32>, vector<16x128xf32>, vector<8x128xf32> -> vector<8x128xf32>
    %c0_3 = arith.constant 0 : index
    %c0_4 = arith.constant 0 : index
    %4 = vector.load %arg3[%c0_3, %c0_4] : memref<8x1xf32, #tpu.memory_space<vmem>>, vector<8x1xf32>
    %5 = vector.broadcast %4 : vector<8x1xf32> to vector<8x128xf32>
    %6 = arith.addf %3, %5 : vector<8x128xf32>
    %cst_5 = arith.constant 0.000000e+00 : f32
    %7 = vector.broadcast %cst_5 : f32 to vector<8x128xf32>
    %8 = arith.maximumf %6, %7 : vector<8x128xf32>
    %c0_6 = arith.constant 0 : index
    %c0_7 = arith.constant 0 : index
    %9 = vector.load %arg4[%c0_6, %c0_7] : memref<4x8xf32, #tpu.memory_space<vmem>>, vector<4x8xf32>
    %cst_8 = arith.constant dense<0.000000e+00> : vector<4x128xf32>
    %10 = tpu.matmul %9, %8, %cst_8 {dimension_numbers = #tpu.dot_dimension_numbers<[1], [0], [0], [1], [0, 0, 1, 1], [], []>} : vector<4x8xf32>, vector<8x128xf32>, vector<4x128xf32> -> vector<4x128xf32>
    %c0_9 = arith.constant 0 : index
    %c0_10 = arith.constant 0 : index
    %11 = vector.load %arg5[%c0_9, %c0_10] : memref<4x1xf32, #tpu.memory_space<vmem>>, vector<4x1xf32>
    %12 = vector.broadcast %11 : vector<4x1xf32> to vector<4x128xf32>
    %13 = arith.addf %10, %12 : vector<4x128xf32>
    %cst_11 = arith.constant 0.000000e+00 : f32
    %14 = vector.broadcast %cst_11 : f32 to vector<4x128xf32>
    %15 = arith.maximumf %13, %14 : vector<4x128xf32>
    %c0_12 = arith.constant 0 : index
    %c0_13 = arith.constant 0 : index
    %16 = vector.load %arg6[%c0_12, %c0_13] : memref<1x4xf32, #tpu.memory_space<vmem>>, vector<1x4xf32>
    %cst_14 = arith.constant dense<0.000000e+00> : vector<1x128xf32>
    %17 = tpu.matmul %16, %15, %cst_14 {dimension_numbers = #tpu.dot_dimension_numbers<[1], [0], [0], [1], [0, 0, 1, 1], [], []>} : vector<1x4xf32>, vector<4x128xf32>, vector<1x128xf32> -> vector<1x128xf32>
    %c0_15 = arith.constant 0 : index
    %c0_16 = arith.constant 0 : index
    %18 = vector.load %arg7[%c0_15, %c0_16] : memref<1x1xf32, #tpu.memory_space<vmem>>, vector<1x1xf32>
    %19 = vector.broadcast %18 : vector<1x1xf32> to vector<1x128xf32>
    %20 = arith.addf %17, %19 : vector<1x128xf32>
    %c0_17 = arith.constant 0 : index
    %c0_18 = arith.constant 0 : index
    %21 = vector.load %arg8[%c0_17, %c0_18] : memref<1x128xf32, #tpu.memory_space<vmem>>, vector<1x128xf32>
    tpu.vector_store %arg8[%c0_17, %c0_18], %20 {strides = array<i32>} : memref<1x128xf32, #tpu.memory_space<vmem>>, vector<1x128xf32>,
    return
  }
  func.func @transform_0(%arg0: i32) -> (i32, i32) {
    %c0_i32 = arith.constant 0 : i32
    %c0_i32_0 = arith.constant 0 : i32
    return %arg0, %c0_i32 : i32, i32
  }
  func.func @transform_1(%arg0: i32) -> (i32, i32) {
    %c0_i32 = arith.constant 0 : i32
    %c0_i32_0 = arith.constant 0 : i32
    %c0_i32_1 = arith.constant 0 : i32
    return %c0_i32, %c0_i32_0 : i32, i32
  }
  func.func @transform_2(%arg0: i32) -> (i32, i32) {
    %c0_i32 = arith.constant 0 : i32
    %c0_i32_0 = arith.constant 0 : i32
    %c0_i32_1 = arith.constant 0 : i32
    return %c0_i32, %c0_i32_0 : i32, i32
  }
  func.func @transform_3(%arg0: i32) -> (i32, i32) {
    %c0_i32 = arith.constant 0 : i32
    %c0_i32_0 = arith.constant 0 : i32
    %c0_i32_1 = arith.constant 0 : i32
    return %c0_i32, %c0_i32_0 : i32, i32
  }
  func.func @transform_4(%arg0: i32) -> (i32, i32) {
    %c0_i32 = arith.constant 0 : i32
    %c0_i32_0 = arith.constant 0 : i32
    %c0_i32_1 = arith.constant 0 : i32
    return %c0_i32, %c0_i32_0 : i32, i32
  }
  func.func @transform_5(%arg0: i32) -> (i32, i32) {
    %c0_i32 = arith.constant 0 : i32
    %c0_i32_0 = arith.constant 0 : i32
    %c0_i32_1 = arith.constant 0 : i32
    return %c0_i32, %c0_i32_0 : i32, i32
  }
  func.func @transform_6(%arg0: i32) -> (i32, i32) {
    %c0_i32 = arith.constant 0 : i32
    %c0_i32_0 = arith.constant 0 : i32
    %c0_i32_1 = arith.constant 0 : i32
    return %c0_i32, %c0_i32_0 : i32, i32
  }
  func.func @transform_7(%arg0: i32) -> (i32, i32) {
    %c0_i32 = arith.constant 0 : i32
    %c0_i32_0 = arith.constant 0 : i32
    return %c0_i32, %arg0 : i32, i32
  }
}

</mosaic_0001>

<bundles_post_ra>
// kernel: tpu_custom_call.1
= control target key start
LH: loop header
LB: loop body
LE: loop exit
PB: predicated region body
PF: predicated region fallthrough
CT: control target
= control target key end

     0   :  { %s659_s0 = inlined_call_operand.vmem [shape: f32[128,16], index: 0, kind: input, shape index: {}]   ;;  %s660_s1 = inlined_call_operand.vmem [shape: f32[8,16], index: 1, kind: input, shape index: {}]   ;;  %s661_s2 = inlined_call_operand.vmem [shape: f32[8,1], index: 2, kind: input, shape index: {}]   ;;  %s662_s3 = inlined_call_operand.vmem [shape: f32[4,8], index: 3, kind: input, shape index: {}]   ;;  %s663_s4 = inlined_call_operand.vmem [shape: f32[4,1], index: 4, kind: input, shape index: {}]   ;;  %s664_s5 = inlined_call_operand.vmem [shape: f32[1,4], index: 5, kind: input, shape index: {}]   ;;  %s665_s6 = inlined_call_operand.<no memory space> [shape: f32[1,1], index: 6, kind: input, shape index: {}]   ;;  %s666_s7 = inlined_call_operand.hbm [shape: f32[1,128], index: 7, kind: output, shape index: {}]  }
   0x1   :  { %v12_v0 = vstv %s665_s6 }
   0x2   :  { %13 = vst [vmem:[#allocation2] sm:$0x1] %v12_v0 }
   0x3   :  { %v29_v1 = vld [vmem:[%s659_s0] sm:$0xff]  ;;  %v30_v2 = vld [vmem:[%s659_s0 + $0x8] sm:$0xff]  ;;  %vm52_vm0 = vcmask 130048   ;;  %v510_v3 = vmov 0.0|0.0   ;;  %vm511_vm2 = vmmov 0   ;;  %v512_v6 = vmov 0.0  }
   0x4   :  { %447 = vmatprep.subr.bf16.mxu0 %v510_v3  ;;  %v448_v4 = vpack.c.bf16 %v30_v2, %v29_v1  ;;  %vm566_vm1 = vmpackc.low %vm52_vm0, %vm52_vm0  ;;  %434 = vmatprep.mubr.msk.f32.mxu0 %vm511_vm2, %v512_v6  ;;  %v513_v7 = vmov 0   ;;  %v31_v8 = vld [vmem:[%s659_s0 + $0x10] sm:$0xff]  ;;  %v32_v9 = vld [vmem:[%s659_s0 + $0x18] sm:$0xff] }
   0x5   :  { %484 = vset.pattern.permute.xlu0 %v513_v7  ;;  %437 = vmatprep.subr.mxu1 %v512_v6  ;;  %v46_v10 = vld [vmem:[%s661_s2] sm:$0xff] }
   0x6   :  { %450 = vmatpush3.bf16.xpose.msk.msra.mxu0 %vm566_vm1, %v448_v4  ;;  %439 = vmatprep.mubr.msk.f32.mxu1 %vm511_vm2, %v512_v6 }
   0x7   :  { %451 = vmatprep.subr.bf16.mxu0 %v510_v3  ;;  %485 = vset.pattern.permute.xlu1 %v513_v7 }
   0x8   :  { %14 = vsyncpa [#allocation4], 0  ;;  %v452_v11 = vpack.c.bf16 %v32_v9, %v31_v8  ;;  %49 = vperm.xlu0 %484, %v46_v10   ;;  %v176_v12 = vld [vmem:[%s663_s4] sm:$0xf]  ;;  %v34_v14 = vld [vmem:[%s659_s0 + $0x28] sm:$0xff]  ;;  %vm182_vm3 = vcmask 64512   ;;  %v264_v45 = vlaneseq }
   0x9   :  { %v33_v13 = vld [vmem:[%s659_s0 + $0x20] sm:$0xff]  ;;  %v35_v16 = vld [vmem:[%s659_s0 + $0x30] sm:$0xff]  ;;  %v36_v17 = vld [vmem:[%s659_s0 + $0x38] sm:$0xff]  ;;  %vm272_vm4 = vcmask 1043456   ;;  %vm268_vm5 = vcmask 31744  }
   0xa   :  { %v456_v15 = vpack.c.bf16 %v34_v14, %v33_v13  ;;  %v460_v18 = vpack.c.bf16 %v36_v17, %v35_v16  ;;  %v37_v19 = vld [vmem:[%s659_s0 + $0x40] sm:$0xff]  ;;  %v38_v20 = vld [vmem:[%s659_s0 + $0x48] sm:$0xff]  ;;  %v39_v22 = vld [vmem:[%s659_s0 + $0x50] sm:$0xff]  ;;  %v265_v46 = vshrl.u32 %v264_v45, 7 }
   0xb   :  { %v464_v21 = vpack.c.bf16 %v38_v20, %v37_v19  ;;  %v40_v23 = vld [vmem:[%s659_s0 + $0x58] sm:$0xff]  ;;  %v41_v25 = vld [vmem:[%s659_s0 + $0x60] sm:$0xff]  ;;  %v42_v26 = vld [vmem:[%s659_s0 + $0x68] sm:$0xff] }
   0xc   :  { %179 = vperm.xlu0 %484, %v176_v12   ;;  %v468_v24 = vpack.c.bf16 %v40_v23, %v39_v22  ;;  %v472_v27 = vpack.c.bf16 %v42_v26, %v41_v25  ;;  %v43_v28 = vld [vmem:[%s659_s0 + $0x70] sm:$0xff]  ;;  %v44_v29 = vld [vmem:[%s659_s0 + $0x78] sm:$0xff]  ;;  %v45_v31 = vld [vmem:[%s660_s1] sm:$0xff]  ;;  %v266_v47 = vsub.s32 0, %v265_v46 }
   0xd   :  { %v476_v30 = vpack.c.bf16 %v44_v29, %v43_v28  ;;  %v175_v37 = vld [vmem:[%s662_s3] sm:$0xf]  ;;  %s514_s3 = smov [#allocation3]  }
   0xe   :  { %454 = vmatpush3.bf16.xpose.msk.msra.mxu0 %vm566_vm1, %v452_v11  ;;  %v258_v38 = vld [vmem:[#allocation2] sm:$0x1]  ;;  %s353_s16 = sshll.u32 %s514_s3, 4  ;;  %s354_s16 = int_to_ptr.vmem [resolvable:$true] %s353_s16 }
   0xf   :  { %455 = vmatprep.subr.bf16.mxu0 %v510_v3  ;;  %261 = vperm.xlu1 %485, %v258_v38   ;;  %v257_v44 = vld [vmem:[%s664_s5] sm:$0x1]  ;;  %s486_s17 = scalar_lea.vmem %s354_s16, 16  ;;  %s490_s2 = scalar_lea.vmem %s354_s16, 32 }
  0x10   :  { %p487_p0 = scmp.ne.s32.totalorder %s354_s16, %s486_s17  ;;  %p491_p1 = scmp.lt.s32.totalorder %s354_s16, %s354_s16 }
  0x11   :  { %p492_p2 = scmp.lt.s32.totalorder %s490_s2, %s486_s17 }
  0x13   :  { %p493_p3 = por %p492_p2, %p491_p1 }
  0x15   :  { %p494_p4 = pnand %p493_p3, %p487_p0 }
  0x16   :  { %458 = vmatpush3.bf16.xpose.msk.msra.mxu0 %vm566_vm1, %v456_v15 }
  0x17   :  { %459 = vmatprep.subr.bf16.mxu0 %v510_v3 }
  0x1e   :  { %462 = vmatpush3.bf16.xpose.msk.msra.mxu0 %vm566_vm1, %v460_v18 }
  0x1f   :  { %463 = vmatprep.subr.bf16.mxu0 %v510_v3 }
  0x26   :  { %466 = vmatpush3.bf16.xpose.msk.msra.mxu0 %vm566_vm1, %v464_v21 }
  0x27   :  { %467 = vmatprep.subr.bf16.mxu0 %v510_v3 }
  0x2e   :  { %470 = vmatpush3.bf16.xpose.msk.msra.mxu0 %vm566_vm1, %v468_v24 }
  0x2f   :  { %471 = vmatprep.subr.bf16.mxu0 %v510_v3 }
  0x36   :  { %474 = vmatpush3.bf16.xpose.msk.msra.mxu0 %vm566_vm1, %v472_v27 }
  0x37   :  { %475 = vmatprep.subr.bf16.mxu0 %v510_v3 }
  0x3e   :  { %478 = vmatpush3.bf16.xpose.msk.msra.mxu0 %vm566_vm1, %v476_v30 }
  0x45   :  { %435 = vmatmul.mubr.msk.f32.vlgmr.msra.gmra.mrb[0].mxu0 %vm52_vm0, %v45_v31 }
  0x87   :  { %v50_v32 = vpop.permute.xlu0 %49 }
  0x8b   :  { %v180_v39 = vpop.permute.xlu0 %179 }
  0x8e   :  { %v262_v48 = vpop.permute.xlu1 %261 }
  0x8f   :  { %v267_v49 = vrot.slane %v262_v48, %v266_v47 }
 0x118   :  { %v170_v33 = vpop.f32.mrb[0].mxu0 }
 0x119   :  { %v171_v34 = vadd.f32 %v170_v33, %v50_v32  ;;  %v436_v35 = vpop.f32.mrb[1].mxu0 }
 0x11b   :  { %v174_v36 = vmax.f32 %v171_v34, 0.0 }
 0x11d   :  { %438 = vmatpush3.msra.mxu1 %v174_v36 }
 0x11e   :  { %440 = vmatmul.mubr.msk.f32.vlgmr.msra.gmra.mrb[0].mxu1 %vm182_vm3, %v175_v37  ;;  %442 = vmatprep.subr.mxu1 %v512_v6 }
 0x11f   :  { %444 = vmatprep.mubr.msk.f32.mxu1 %vm511_vm2, %v512_v6 }
 0x1f1   :  { %v252_v40 = vpop.f32.mrb[0].mxu1 }
 0x1f2   :  { %v253_v41 = vadd.f32 %v252_v40, %v180_v39  ;;  %v441_v42 = vpop.f32.mrb[1].mxu1 }
 0x1f4   :  { %v256_v43 = vmax.f32 %v253_v41, 0.0 }
 0x1f6   :  { %443 = vmatpush3.msk.msra.mxu1 %vm272_vm4, %v256_v43 }
 0x1f7   :  { %445 = vmatmul.mubr.msk.f32.vlgmr.msra.gmra.mrb[2].mxu1 %vm268_vm5, %v257_v44 }
 0x2ca   :  { %v342_v50 = vpop.f32.mrb[2].mxu1 }
 0x2cb   :  { %v343_v51 = vadd.f32 %v342_v50, %v267_v49  ;;  %v446_v52 = vpop.f32.mrb[3].mxu1 }
 0x2cd   :  { %346 = vst [vmem:[#allocation3] sm:$0x1] %v343_v51 }
 0x2ce   :  { %497 = shalt.err (!%p494_p4)
}
 0x2cf   :  { %s498_s18 = scalar_lea.hbm %s666_s7, 16 }
 0x2d0   :  { %p499_p5 = scmp.ne.s32.totalorder %s666_s7, %s498_s18  ;;  %p502_p6 = scmp.lt.u32.totalorder %s498_s18, %s666_s7 }
 0x2d2   :  { %p504_p7 = pnand %p502_p6, %p499_p5 }
 0x2d4   :  { %507 = shalt.err (!%p504_p7)
}
 0x2d5   :  { %356 = dma.vmem_to_hbm [thread:$0]  %s354_s16, 16, %s666_s7, [#allocation4]  }
 0x2d6   :  { %508 = dma.done.wait [#allocation4], 16  }
 0x2d7   :  { %509 = vsyncadd [#allocation4], 4294967280 }
 0x2d8   :  { %360 = vsyncpa [#allocation4], 1 }

</bundles_post_ra>
